<compile_context>
chip_gen: v7x
topology: tpu7x:2x2x1
jax: 0.10.0
libtpu: 0.0.40
codegen_flags: <defaults>
</compile_context>

<pallas_src>
import math

import jax
import jax.numpy as jnp
from jax.experimental import pallas as pl
from jax.experimental.pallas import tpu as pltpu

_TR_MAX = 2048    # max rows (of 128 lanes) per half per grid step -> 1 MiB/half/block
_NUM_CORES = 2    # leading "parallel" grid axis (v7x: 2 TCs/chip; harmless on 1-TC chips)


def _round_up(x: int, m: int) -> int:
    return ((x + m - 1) // m) * m


def _domain_cls_loss_kernel(d_s_ref, d_t_ref, part_ref):
    """One grid step over (tr, 128) lane-dense blocks of the source / target halves.

    Accumulates lane-wise partial sums into this core's (4, 128) output block:
      row 0: sum(max(log(d_s),     -100))   (negated NLL for label 1 -> sign in wrapper)
      row 1: sum(max(log(1 - d_t), -100))   (negated NLL for label 0 -> sign in wrapper)
      row 2: count(d_s >= 0.5)
      row 3: count(d_t <  0.5)
    """
    i = pl.program_id(1)

    @pl.when(i == 0)
    def _init():
        part_ref[...] = jnp.zeros_like(part_ref)

    d_s = d_s_ref[...].astype(jnp.float32)   # pads are 1.0 -> log = 0, counted "correct"
    d_t = d_t_ref[...].astype(jnp.float32)   # pads are 0.0 -> log1m = 0, counted "correct"

    # F.binary_cross_entropy clamps its log terms at -100 (log(0) -> -inf -> -100).
    logp_s = jnp.maximum(jnp.log(d_s), -100.0)
    logp_t = jnp.maximum(jnp.log(1.0 - d_t), -100.0)
    corr_s = (d_s >= 0.5).astype(jnp.float32)
    corr_t = (d_t < 0.5).astype(jnp.float32)

    part = jnp.concatenate([
        jnp.sum(logp_s, axis=0, keepdims=True),
        jnp.sum(logp_t, axis=0, keepdims=True),
        jnp.sum(corr_s, axis=0, keepdims=True),
        jnp.sum(corr_t, axis=0, keepdims=True),
    ], axis=0)                                # (4, 128)
    part_ref[...] += part


@jax.jit
def _domain_cls_loss_jit(d: jax.Array, coeff: jax.Array):
    """d: (N, 1) or (N,) probabilities, N even. Returns (loss, acc) f32 scalars."""
    n = d.shape[0]
    assert n % 2 == 0 and n >= 2, "N must be even (source/target chunks)"
    half = n // 2

    d_flat = jnp.reshape(d, (n,))
    if d_flat.dtype not in (jnp.dtype(jnp.float32), jnp.dtype(jnp.bfloat16)):
        d_flat = d_flat.astype(jnp.float32)
    d_s = d_flat[:half]
    d_t = d_flat[half:]

    # Lane-dense tiling: each half becomes r rows of 128 lanes, split across
    # _NUM_CORES "parallel" slices of blocks_per_core blocks of tr rows each.
    r0 = max(1, (half + 127) // 128)
    blocks_per_core = max(1, -(-r0 // (_NUM_CORES * _TR_MAX)))
    total_blocks = _NUM_CORES * blocks_per_core
    tr = _round_up(-(-r0 // total_blocks), 8)
    r = total_blocks * tr
    n_pad = r * 128 - half

    # Loss-neutral pads; under jit this fuses into a single copy per half.
    d_s_p = jnp.pad(d_s, (0, n_pad), constant_values=1.0).reshape(r, 128)
    d_t_p = jnp.pad(d_t, (0, n_pad), constant_values=0.0).reshape(r, 128)

    row_spec = pl.BlockSpec(
        (tr, 128), lambda c, i, b=blocks_per_core: (c * b + i, 0))

    parts = pl.pallas_call(
        _domain_cls_loss_kernel,
        out_shape=jax.ShapeDtypeStruct((_NUM_CORES, 4, 128), jnp.float32),
        grid=(_NUM_CORES, blocks_per_core),
        in_specs=[row_spec, row_spec],
        out_specs=pl.BlockSpec((None, 4, 128), lambda c, i: (c, 0, 0)),
        compiler_params=pltpu.CompilerParams(
            dimension_semantics=("parallel", "arbitrary")),
    )(d_s_p, d_t_p)                           # (_NUM_CORES, 4, 128)

    sums = jnp.sum(parts, axis=(0, 2))        # (4,) cross-core + cross-lane reduce
    inv_half = 1.0 / float(half)
    # Pads contribute 0 to the log sums and exactly n_pad to each "correct" count.
    loss = coeff * (-0.5 * inv_half) * (sums[0] + sums[1])
    acc = (50.0 * inv_half) * (sums[2] + sums[3] - 2.0 * float(n_pad))
    return loss, acc


class DomainClsLoss:
    """Stateful wrapper mirroring the PyTorch module (iter_num / max_iters / acc)."""

    def __init__(self):
        self.iter_num = 0
        self.max_iters = 1000
        self.domain_cls_acc = 0.0

    def __call__(self, d: jax.Array) -> jax.Array:
        coeff = 2.0 / (1.0 + math.exp(-self.iter_num / self.max_iters)) - 1.0
        # TODO(synk): for typical domain-adaptation batch sizes this op is
        # launch-bound; fuse it into the upstream discriminator kernel / jitted
        # graph if it shows up in profiles.
        loss, acc = _domain_cls_loss_jit(d, jnp.float32(coeff))
        self.domain_cls_acc = acc
        self.step()
        return loss

    def step(self):
        self.iter_num += 1


def _reference(d, coeff):
    # Pure-JAX reference for sanity checking (loss and accuracy).
    half = d.shape[0] // 2
    d_s = d[:half, 0]
    d_t = d[half:, 0]
    bce_s = jnp.mean(-jnp.maximum(jnp.log(d_s), -100.0))
    bce_t = jnp.mean(-jnp.maximum(jnp.log(1.0 - d_t), -100.0))
    loss = coeff * 0.5 * (bce_s + bce_t)
    acc = 50.0 * (jnp.mean((d_s >= 0.5).astype(jnp.float32))
                  + jnp.mean((d_t < 0.5).astype(jnp.float32)))
    return loss, acc


if __name__ == "__main__":
    key = jax.random.PRNGKey(0)
    B = 100                      # source batch size; N = 2*B discriminator rows
    N = 2 * B
    # Discriminator outputs: probabilities strictly inside (0, 1).
    d = jax.random.uniform(key, (N, 1), dtype=jnp.float32, minval=0.05, maxval=0.95)

    module = DomainClsLoss()
    loss0 = module(d)            # iter_num = 0 -> coeff = 0 -> loss = 0
    loss1 = module(d)            # iter_num = 1 -> small positive coeff
    acc1 = module.domain_cls_acc
    jax.block_until_ready((loss0, loss1, acc1))

    coeff1 = 2.0 / (1.0 + math.exp(-1.0 / 1000.0)) - 1.0
    ref_loss, ref_acc = _reference(d, coeff1)
    assert abs(float(loss0)) < 1e-6, float(loss0)
    assert abs(float(loss1) - float(ref_loss)) < 1e-5, (float(loss1), float(ref_loss))
    assert abs(float(acc1) - float(ref_acc)) < 1e-3, (float(acc1), float(ref_acc))

    # Ragged / multi-row sanity check (exercises padding and both grid slices).
    N2 = 2 * 1337
    d2 = jax.random.uniform(jax.random.PRNGKey(1), (N2, 1), dtype=jnp.float32,
                            minval=0.001, maxval=0.999)
    loss2, acc2 = _domain_cls_loss_jit(d2, jnp.float32(0.3))
    ref_loss2, ref_acc2 = _reference(d2, 0.3)
    jax.block_until_ready((loss2, acc2))
    assert abs(float(loss2) - float(ref_loss2)) < 1e-4, (float(loss2), float(ref_loss2))
    assert abs(float(acc2) - float(ref_acc2)) < 1e-3, (float(acc2), float(ref_acc2))

    print("KERNEL_OK")
</pallas_src>

<mosaic_0001>
module attributes {stable_mosaic.version = 11 : i64} {
  func.func @_domain_cls_loss_kernel(%arg0: i32, %arg1: i32, %arg2: memref<8x128xf32, #tpu.memory_space<vmem>>, %arg3: memref<8x128xf32, #tpu.memory_space<vmem>>, %arg4: memref<1x4x128xf32, #tpu.memory_space<vmem>>) attributes {dimension_semantics = [#tpu.dimension_semantics<parallel>, #tpu.dimension_semantics<arbitrary>], iteration_bounds = array<i64: 2, 1>, scalar_prefetch = 0 : i64, scratch_operands = 0 : i64, tpu.core_type = #tpu.core_type<tc>, window_params = [{transform_indices = @transform_0, window_bounds = array<i64: 8, 128>}, {transform_indices = @transform_1, window_bounds = array<i64: 8, 128>}, {transform_indices = @transform_2, window_bounds = array<i64: 1, 4, 128>}]} {
    %c0_i32 = arith.constant 0 : i32
    %0 = arith.cmpi eq, %arg1, %c0_i32 : i32
    %1 = arith.extui %0 : i1 to i32
    %c0_i32_0 = arith.constant 0 : i32
    %2 = arith.cmpi ne, %1, %c0_i32_0 : i32
    scf.if %2 {
      %cst_18 = arith.constant 0.000000e+00 : f32
      %36 = vector.broadcast %cst_18 : f32 to vector<4x128xf32>
      %c0_19 = arith.constant 0 : index
      %c0_20 = arith.constant 0 : index
      %c0_21 = arith.constant 0 : index
      %37 = vector.load %arg4[%c0_19, %c0_20, %c0_21] : memref<1x4x128xf32, #tpu.memory_space<vmem>>, vector<1x4x128xf32>
      %38 = vector.shape_cast %37 : vector<1x4x128xf32> to vector<4x128xf32>
      %39 = vector.shape_cast %36 : vector<4x128xf32> to vector<1x4x128xf32>
      tpu.vector_store %arg4[%c0_19, %c0_20, %c0_21], %39 {strides = array<i32>} : memref<1x4x128xf32, #tpu.memory_space<vmem>>, vector<1x4x128xf32>,
    } else {
    }
    %c0 = arith.constant 0 : index
    %c0_1 = arith.constant 0 : index
    %3 = vector.load %arg2[%c0, %c0_1] : memref<8x128xf32, #tpu.memory_space<vmem>>, vector<8x128xf32>
    %c0_2 = arith.constant 0 : index
    %c0_3 = arith.constant 0 : index
    %4 = vector.load %arg3[%c0_2, %c0_3] : memref<8x128xf32, #tpu.memory_space<vmem>>, vector<8x128xf32>
    %5 = math.log %3 : vector<8x128xf32>
    %cst = arith.constant -1.000000e+02 : f32
    %6 = vector.broadcast %cst : f32 to vector<8x128xf32>
    %7 = arith.maximumf %5, %6 : vector<8x128xf32>
    %cst_4 = arith.constant 1.000000e+00 : f32
    %8 = vector.broadcast %cst_4 : f32 to vector<8x128xf32>
    %9 = arith.subf %8, %4 : vector<8x128xf32>
    %10 = math.log %9 : vector<8x128xf32>
    %cst_5 = arith.constant -1.000000e+02 : f32
    %11 = vector.broadcast %cst_5 : f32 to vector<8x128xf32>
    %12 = arith.maximumf %10, %11 : vector<8x128xf32>
    %cst_6 = arith.constant 5.000000e-01 : f32
    %13 = vector.broadcast %cst_6 : f32 to vector<8x128xf32>
    %14 = arith.cmpf oge, %3, %13 : vector<8x128xf32>
    %15 = arith.extui %14 : vector<8x128xi1> to vector<8x128xi32>
    %16 = arith.sitofp %15 : vector<8x128xi32> to vector<8x128xf32>
    %cst_7 = arith.constant 5.000000e-01 : f32
    %17 = vector.broadcast %cst_7 : f32 to vector<8x128xf32>
    %18 = arith.cmpf olt, %4, %17 : vector<8x128xf32>
    %19 = arith.extui %18 : vector<8x128xi1> to vector<8x128xi32>
    %20 = arith.sitofp %19 : vector<8x128xi32> to vector<8x128xf32>
    %cst_8 = arith.constant dense<0.000000e+00> : vector<128xf32>
    %21 = vector.multi_reduction <add>, %7, %cst_8 [0] : vector<8x128xf32> to vector<128xf32>
    %22 = vector.shape_cast %21 : vector<128xf32> to vector<1x128xf32>
    %cst_9 = arith.constant dense<0.000000e+00> : vector<128xf32>
    %23 = vector.multi_reduction <add>, %12, %cst_9 [0] : vector<8x128xf32> to vector<128xf32>
    %24 = vector.shape_cast %23 : vector<128xf32> to vector<1x128xf32>
    %cst_10 = arith.constant dense<0.000000e+00> : vector<128xf32>
    %25 = vector.multi_reduction <add>, %16, %cst_10 [0] : vector<8x128xf32> to vector<128xf32>
    %26 = vector.shape_cast %25 : vector<128xf32> to vector<1x128xf32>
    %cst_11 = arith.constant dense<0.000000e+00> : vector<128xf32>
    %27 = vector.multi_reduction <add>, %20, %cst_11 [0] : vector<8x128xf32> to vector<128xf32>
    %28 = vector.shape_cast %27 : vector<128xf32> to vector<1x128xf32>
    %29 = tpu.concatenate %22, %24, %26, %28 in 0 : vector<1x128xf32>, vector<1x128xf32>, vector<1x128xf32>, vector<1x128xf32> -> vector<4x128xf32>
    %c0_12 = arith.constant 0 : index
    %c0_13 = arith.constant 0 : index
    %c0_14 = arith.constant 0 : index
    %30 = vector.load %arg4[%c0_12, %c0_13, %c0_14] : memref<1x4x128xf32, #tpu.memory_space<vmem>>, vector<1x4x128xf32>
    %31 = vector.shape_cast %30 : vector<1x4x128xf32> to vector<4x128xf32>
    %32 = arith.addf %31, %29 : vector<4x128xf32>
    %c0_15 = arith.constant 0 : index
    %c0_16 = arith.constant 0 : index
    %c0_17 = arith.constant 0 : index
    %33 = vector.load %arg4[%c0_15, %c0_16, %c0_17] : memref<1x4x128xf32, #tpu.memory_space<vmem>>, vector<1x4x128xf32>
    %34 = vector.shape_cast %33 : vector<1x4x128xf32> to vector<4x128xf32>
    %35 = vector.shape_cast %32 : vector<4x128xf32> to vector<1x4x128xf32>
    tpu.vector_store %arg4[%c0_15, %c0_16, %c0_17], %35 {strides = array<i32>} : memref<1x4x128xf32, #tpu.memory_space<vmem>>, vector<1x4x128xf32>,
    return
  }
  func.func @transform_0(%arg0: i32, %arg1: i32) -> (i32, i32) {
    %c1_i32 = arith.constant 1 : i32
    %0 = arith.muli %arg0, %c1_i32 : i32
    %1 = arith.addi %0, %arg1 : i32
    %c0_i32 = arith.constant 0 : i32
    %c0_i32_0 = arith.constant 0 : i32
    return %1, %c0_i32 : i32, i32
  }
  func.func @transform_1(%arg0: i32, %arg1: i32) -> (i32, i32) {
    %c1_i32 = arith.constant 1 : i32
    %0 = arith.muli %arg0, %c1_i32 : i32
    %1 = arith.addi %0, %arg1 : i32
    %c0_i32 = arith.constant 0 : i32
    %c0_i32_0 = arith.constant 0 : i32
    return %1, %c0_i32 : i32, i32
  }
  func.func @transform_2(%arg0: i32, %arg1: i32) -> (i32, i32, i32) {
    %c0_i32 = arith.constant 0 : i32
    %c0_i32_0 = arith.constant 0 : i32
    %c0_i32_1 = arith.constant 0 : i32
    return %arg0, %c0_i32, %c0_i32_0 : i32, i32, i32
  }
}

</mosaic_0001>

<bundles_post_ra>
// kernel: _domain_cls_loss_jit.1
= control target key start
LH: loop header
LB: loop body
LE: loop exit
PB: predicated region body
PF: predicated region fallthrough
CT: control target
= control target key end

     0   :  { %s389_s9 = smov 0   ;;  %s391_s10 = smov 0   ;;  %s430_s0 = inlined_call_operand.vmem [shape: f32[16,128], index: 0, kind: input, shape index: {}]   ;;  %s431_s1 = inlined_call_operand.vmem [shape: f32[16,128], index: 1, kind: input, shape index: {}]   ;;  %s432_s2 = inlined_call_operand.vmem [shape: f32[2,4,128], index: 2, kind: output, shape index: {}]  }
   0x1   :  { %s393_s11 = smov 0  }
   0x2 LB: > { %s24_s12 = sadd.s32 1, %s367_s10  ;;  %p312_p0 = scmp.ge.s32.totalorder %s371_s11, 1  ;;  %s371_s11 = sphi %s393_s11, %s12_s11   ;;  %s367_s10 = sphi %s391_s10, %s434_s10   ;;  %s363_s9 = sphi %s389_s9, %s433_s9  }
   0x3   : > { %p26_p1 = scmp.ge.s32.totalorder %s24_s12, 2  ;;  %p140_p2 = scmp.lt.s32.totalorder %s371_s11, 3 }
   0x5   : > { %s436_s12 = smov (%p26_p1, %s24_s12), 0  ;;  %p141_p3 = pnand %p312_p0, %p140_p2 }
   0x6   : > { %p167_p4 = scmp.lt.s32.totalorder (!%p141_p3), %s363_s9, 1  ;;  %v373_v2 = vmov (!%p141_p3), 0.0   ;;  %vm226_vm2 = vcmask (!%p141_p3), 1040384   ;;  %vm228_vm3 = vcmask (!%p141_p3), 1041408   ;;  %vm230_vm4 = vcmask (!%p141_p3), 1042432  }
   0x7   : > { %144 = sbr.rel (%p141_p3) target bundleno = 54 (0x36), region = 28 }
   0xe   : > { %s438_s9 = smov (!%p167_p4, %s363_s9), 1 }
   0xf   : > { %s313_s13 = sshll.u32 %s438_s9, 3  ;;  %s315_s14 = sshll.u32 %s438_s9, 2 }
  0x10   : > { %s170_s17 = scalar_lea.vmem %s430_s0, %s313_s13  ;;  %s176_s20 = scalar_lea.vmem %s431_s1, %s313_s13 }
  0x11   : > { %s416_s23 = scalar_lea.vmem %s432_s2, %s315_s14  ;;  %v187_v0 = vld [vmem:[%s170_s17] sm:$0xff] }
  0x12   : > { %v188_v1 = vld [vmem:[%s176_s20] sm:$0xff]  ;;  %186 = vst [vmem:[%s416_s23] sm:$0xf] %v373_v2  ;;  %345 = vlog2.f32 %v187_v0  ;;  %vm196_vm0 = vcmp.ge.f32.partialorder %v187_v0, 0.5 }
  0x13   : > { %v192_v3 = vsub.f32 1.0, %v188_v1  ;;  %vm199_vm1 = vcmp.lt.f32.partialorder %v188_v1, 0.5  ;;  %v316_v4 = vsel %vm196_vm0, 1.0, %v373_v2 }
  0x14   : > { %v317_v5 = vsel %vm199_vm1, 1.0, %v373_v2  ;;  %v214_v6 = vrot.slane %v316_v4, 4 }
  0x15   : > { %347 = vlog2.f32 %v192_v3  ;;  %v220_v7 = vrot.slane %v317_v5, 4 }
  0x16   : > { %v215_v9 = vadd.f32 %v316_v4, %v214_v6 }
  0x17   : > { %v221_v11 = vadd.f32 %v317_v5, %v220_v7 }
  0x18   : > { %v216_v15 = vrot.slane %v215_v9, 2 }
  0x19   : > { %v222_v18 = vrot.slane %v221_v11, 2  ;;  %v232_v37 = vld [vmem:[%s416_s23] sm:$0xf] }
  0x1a   : > { %v217_v21 = vadd.f32 %v216_v15, %v215_v9 }
  0x1b   : > { %v223_v24 = vadd.f32 %v222_v18, %v221_v11 }
  0x1c   : > { %v346_v8 = vpop.eup %345  ;;  %v218_v27 = vrot.slane %v217_v21, 1 }
  0x1d   : > { %v190_v10 = vmul.f32 0.6931472, %v346_v8  ;;  %v224_v30 = vrot.slane %v223_v24, 1 }
  0x1e   : > { %v219_v33 = vadd.f32 %v218_v27, %v217_v21 }
  0x1f   : > { %v348_v12 = vpop.eup %347  ;;  %v191_v13 = vmax.f32 %v190_v10, -100.0  ;;  %v225_v34 = vadd.f32 %v224_v30, %v223_v24 }
  0x20   : > { %v194_v14 = vmul.f32 0.6931472, %v348_v12 }
  0x21   : > { %v202_v17 = vrot.slane %v191_v13, 4 }
  0x22   : > { %v195_v16 = vmax.f32 %v194_v14, -100.0 }
  0x23   : > { %v203_v19 = vadd.f32 %v202_v17, %v191_v13 }
  0x24   : > { %v208_v20 = vrot.slane %v195_v16, 4 }
  0x25   : > { %v204_v22 = vrot.slane %v203_v19, 2 }
  0x26   : > { %v209_v23 = vadd.f32 %v208_v20, %v195_v16 }
  0x27   : > { %v205_v25 = vadd.f32 %v204_v22, %v203_v19 }
  0x28   : > { %v210_v26 = vrot.slane %v209_v23, 2 }
  0x29   : > { %v206_v28 = vrot.slane %v205_v25, 1 }
  0x2a   : > { %v211_v29 = vadd.f32 %v210_v26, %v209_v23 }
  0x2b   : > { %v207_v31 = vadd.f32 %v206_v28, %v205_v25 }
  0x2c   : > { %v212_v32 = vrot.slane %v211_v29, 1 }
  0x2e   : > { %v213_v35 = vadd.f32 %v212_v32, %v211_v29 }
  0x30   : > { %v227_v36 = vsel %vm226_vm2, %v207_v31, %v213_v35 }
  0x31   : > { %v229_v38 = vsel %vm228_vm3, %v227_v36, %v219_v33 }
  0x32   : > { %v231_v39 = vsel %vm230_vm4, %v229_v38, %v225_v34 }
  0x33   : > { %v233_v40 = vadd.f32 %v232_v37, %v231_v39 }
  0x35   : > { %234 = vst [vmem:[%s416_s23] sm:$0xf] %v233_v40 }
  0x36 PF: > { %s12_s11 = sadd.s32 1, %s371_s11   ;;  %s433_s9 = smov %s367_s10 }
  0x37   : > { %p9_p5 = scmp.ge.s32.totalorder %s12_s11, 4   ;;  %s434_s10 = smov %s436_s12 }
  0x39   :  { %11 = sbr.rel (!%p9_p5) target bundleno = 2 (0x2), region = 65 }

</bundles_post_ra>
